<compile_context>
chip_gen: v5e
topology: v5e:2x2
jax: 0.10.0
libtpu: 0.0.40
codegen_flags: <defaults>
</compile_context>

<pallas_src>
import functools

import jax
import jax.numpy as jnp
from jax.experimental import pallas as pl
from jax.experimental.pallas import tpu as pltpu


def _ct_smooth_l1_kernel(coord_ref, dist_ref, gt_dist_ref, gt_inst_ref,
                         gt_kernel_ref, tmask_ref, loss_ref, iou_ref,
                         loss_acc, mask_acc, total_acc, *,
                         beta, loss_weight, eps, width):
    r = pl.program_id(1)
    num_r = pl.num_programs(1)

    @pl.when(r == 0)
    def _init():
        loss_acc[...] = jnp.zeros_like(loss_acc)
        mask_acc[...] = jnp.zeros_like(mask_acc)
        total_acc[...] = jnp.zeros_like(total_acc)

    N = gt_kernel_ref.shape[2]          # full flattened image size
    T = dist_ref.shape[2]               # tile size along N

    coord = coord_ref[0]                # (2, T) f32: row 0 = x, row 1 = y
    dist = dist_ref[0]                  # (2, T) f32
    gt_dist = gt_dist_ref[0]            # (2, T) f32
    gt_inst = gt_inst_ref[0]            # (1, T) int32
    gt_k = gt_kernel_ref[0]             # (1, N) f32 (full image, resident per batch)
    tmask = tmask_ref[0]                # (1, T) f32

    # ---- select_single: offset points, clipped with W-1 like the module -----
    off = jnp.clip(coord + 10.0 * dist, 0.0, float(width - 1))
    off_i = off.astype(jnp.int32)                       # trunc == .long() (non-negative)
    flat_idx = off_i[1:2, :] * width + off_i[0:1, :]    # (1, T) = y * W + x

    # Gather gt_kernel_instances[off_y, off_x] as a one-hot matmul on the MXU.
    n_iota = jax.lax.broadcasted_iota(jnp.int32, (N, T), 0)
    onehot = (flat_idx == n_iota).astype(jnp.float32)   # (N, T), exactly one 1 per column
    gathered = jnp.dot(gt_k, onehot, preferred_element_type=jnp.float32)  # (1, T)
    gathered_i = gathered.astype(jnp.int32)             # exact for ids < 2^24

    selected = (gt_inst != gathered_i).astype(jnp.float32)   # (1, T)
    stm = selected * tmask                                   # selected_training_mask

    # ---- forward_single: masked smooth-L1 -----------------------------------
    diff = jnp.abs(dist - gt_dist) * stm                     # (2, T)
    smooth = jnp.where(diff < beta, (0.5 / beta) * diff * diff, diff - 0.5 * beta)

    loss_acc[...] += jnp.sum(smooth, keepdims=True)          # (1, 1)
    mask_acc[...] += jnp.sum(stm, keepdims=True)
    total_acc[...] += jnp.sum(tmask, keepdims=True)

    @pl.when(r == num_r - 1)
    def _finalize():
        msum = mask_acc[...]
        tsum = total_acc[...]
        loss_ref[0] = loss_weight * loss_acc[...] / (msum + eps)
        iou_ref[0] = (tsum - msum) / (tsum + 1e-6)


def _pick_tile(n):
    """Largest lane-aligned tile that divides n and leaves >= 2 tiles."""
    for t in (1024, 512, 256, 128):
        if n % t == 0 and n > t:
            return t
    return n


def ct_smooth_l1_loss(distances, gt_instances, gt_kernel_instances,
                      training_masks, gt_distances, *,
                      beta=1.0, loss_weight=1.0, reduce=True):
    """Pallas implementation of SmoothL1Loss.forward. Returns (loss, iou_text)."""
    B, _, H, W = distances.shape
    N = H * W
    T = _pick_tile(N)
    R = N // T

    # Flatten everything to lane-dense (.., N) layouts in the wrapper.
    dist_f = distances.reshape(B, 2, N).astype(jnp.float32)
    gt_dist_f = gt_distances.reshape(B, 2, N).astype(jnp.float32)
    gt_inst_i = gt_instances.reshape(B, 1, N).astype(jnp.int32)
    gt_kernel_f = gt_kernel_instances.reshape(B, 1, N).astype(jnp.float32)
    tmask_f = training_masks.reshape(B, 1, N).astype(jnp.float32)

    # coord table (== the torch module's fixed parameter): channel 0 = x, 1 = y.
    xs = jax.lax.broadcasted_iota(jnp.int32, (H, W), 1)
    ys = jax.lax.broadcasted_iota(jnp.int32, (H, W), 0)
    coord = jnp.stack([xs, ys], axis=0).reshape(1, 2, N).astype(jnp.float32)

    kernel = functools.partial(_ct_smooth_l1_kernel, beta=float(beta),
                               loss_weight=float(loss_weight), eps=1e-6, width=W)

    loss_b, iou_b = pl.pallas_call(
        kernel,
        out_shape=(jax.ShapeDtypeStruct((B, 1, 1), jnp.float32),
                   jax.ShapeDtypeStruct((B, 1, 1), jnp.float32)),
        grid=(B, R),
        in_specs=[
            pl.BlockSpec((1, 2, T), lambda b, r: (0, 0, r)),   # coord (shared)
            pl.BlockSpec((1, 2, T), lambda b, r: (b, 0, r)),   # distances
            pl.BlockSpec((1, 2, T), lambda b, r: (b, 0, r)),   # gt_distances
            pl.BlockSpec((1, 1, T), lambda b, r: (b, 0, r)),   # gt_instances
            pl.BlockSpec((1, 1, N), lambda b, r: (b, 0, 0)),   # gt_kernel (full, resident)
            pl.BlockSpec((1, 1, T), lambda b, r: (b, 0, r)),   # training_masks
        ],
        out_specs=(pl.BlockSpec((1, 1, 1), lambda b, r: (b, 0, 0)),
                   pl.BlockSpec((1, 1, 1), lambda b, r: (b, 0, 0))),
        scratch_shapes=[pltpu.VMEM((1, 1), jnp.float32),
                        pltpu.VMEM((1, 1), jnp.float32),
                        pltpu.VMEM((1, 1), jnp.float32)],
        compiler_params=pltpu.CompilerParams(
            dimension_semantics=("parallel", "arbitrary")),
    )(coord, dist_f, gt_dist_f, gt_inst_i, gt_kernel_f, tmask_f)

    loss_per_batch = loss_b[:, 0, 0]
    iou_text = iou_b[:, 0, 0]
    loss = jnp.mean(loss_per_batch) if reduce else loss_per_batch
    return loss, iou_text


if __name__ == "__main__":
    key = jax.random.PRNGKey(0)
    B, H, W = 2, 16, 16
    k1, k2, k3, k4, k5 = jax.random.split(key, 5)

    distances = jax.random.normal(k1, (B, 2, H, W), jnp.float32)
    gt_distances = jax.random.normal(k2, (B, 2, H, W), jnp.float32)
    gt_instances = jax.random.randint(k3, (B, H, W), 0, 4, jnp.int32)
    gt_kernel_instances = jax.random.randint(k4, (B, H, W), 0, 4, jnp.int32)
    training_masks = (jax.random.uniform(k5, (B, H, W)) > 0.3).astype(jnp.float32)

    loss, iou_text = ct_smooth_l1_loss(
        distances, gt_instances, gt_kernel_instances, training_masks, gt_distances,
        beta=1.0, loss_weight=1.0, reduce=True)
    jax.block_until_ready((loss, iou_text))
    assert loss.shape == () and iou_text.shape == (B,)
    assert bool(jnp.isfinite(loss))
    print("KERNEL_OK")
</pallas_src>

<mosaic_0001>
module attributes {stable_mosaic.version = 11 : i64} {
  func.func @_ct_smooth_l1_kernel(%arg0: i32, %arg1: i32, %arg2: memref<1x2x128xf32, #tpu.memory_space<vmem>>, %arg3: memref<1x2x128xf32, #tpu.memory_space<vmem>>, %arg4: memref<1x2x128xf32, #tpu.memory_space<vmem>>, %arg5: memref<1x1x128xi32, #tpu.memory_space<vmem>>, %arg6: memref<1x1x256xf32, #tpu.memory_space<vmem>>, %arg7: memref<1x1x128xf32, #tpu.memory_space<vmem>>, %arg8: memref<1x1x1xf32, #tpu.memory_space<vmem>>, %arg9: memref<1x1x1xf32, #tpu.memory_space<vmem>>, %arg10: memref<1x1xf32, #tpu.memory_space<vmem>>, %arg11: memref<1x1xf32, #tpu.memory_space<vmem>>, %arg12: memref<1x1xf32, #tpu.memory_space<vmem>>) attributes {dimension_semantics = [#tpu.dimension_semantics<parallel>, #tpu.dimension_semantics<arbitrary>], iteration_bounds = array<i64: 2, 2>, scalar_prefetch = 0 : i64, scratch_operands = 3 : i64, tpu.core_type = #tpu.core_type<tc>, window_params = [{transform_indices = @transform_0, window_bounds = array<i64: 1, 2, 128>}, {transform_indices = @transform_1, window_bounds = array<i64: 1, 2, 128>}, {transform_indices = @transform_2, window_bounds = array<i64: 1, 2, 128>}, {transform_indices = @transform_3, window_bounds = array<i64: 1, 1, 128>}, {transform_indices = @transform_4, window_bounds = array<i64: 1, 1, 256>}, {transform_indices = @transform_5, window_bounds = array<i64: 1, 1, 128>}, {transform_indices = @transform_6, window_bounds = array<i64: 1, 1, 1>}, {transform_indices = @transform_7, window_bounds = array<i64: 1, 1, 1>}]} {
    %c0_i32 = arith.constant 0 : i32
    %0 = arith.cmpi eq, %arg1, %c0_i32 : i32
    %1 = arith.extui %0 : i1 to i32
    %c0_i32_0 = arith.constant 0 : i32
    %2 = arith.cmpi ne, %1, %c0_i32_0 : i32
    scf.if %2 {
      %cst_40 = arith.constant 0.000000e+00 : f32
      %78 = vector.broadcast %cst_40 : f32 to vector<1x1xf32>
      %c0_41 = arith.constant 0 : index
      %c0_42 = arith.constant 0 : index
      %79 = vector.load %arg10[%c0_41, %c0_42] : memref<1x1xf32, #tpu.memory_space<vmem>>, vector<1x1xf32>
      tpu.vector_store %arg10[%c0_41, %c0_42], %78 {strides = array<i32>} : memref<1x1xf32, #tpu.memory_space<vmem>>, vector<1x1xf32>,
      %cst_43 = arith.constant 0.000000e+00 : f32
      %80 = vector.broadcast %cst_43 : f32 to vector<1x1xf32>
      %c0_44 = arith.constant 0 : index
      %c0_45 = arith.constant 0 : index
      %81 = vector.load %arg11[%c0_44, %c0_45] : memref<1x1xf32, #tpu.memory_space<vmem>>, vector<1x1xf32>
      tpu.vector_store %arg11[%c0_44, %c0_45], %80 {strides = array<i32>} : memref<1x1xf32, #tpu.memory_space<vmem>>, vector<1x1xf32>,
      %cst_46 = arith.constant 0.000000e+00 : f32
      %82 = vector.broadcast %cst_46 : f32 to vector<1x1xf32>
      %c0_47 = arith.constant 0 : index
      %c0_48 = arith.constant 0 : index
      %83 = vector.load %arg12[%c0_47, %c0_48] : memref<1x1xf32, #tpu.memory_space<vmem>>, vector<1x1xf32>
      tpu.vector_store %arg12[%c0_47, %c0_48], %82 {strides = array<i32>} : memref<1x1xf32, #tpu.memory_space<vmem>>, vector<1x1xf32>,
    } else {
    }
    %c0 = arith.constant 0 : index
    %c0_1 = arith.constant 0 : index
    %c0_2 = arith.constant 0 : index
    %3 = vector.load %arg2[%c0, %c0_1, %c0_2] : memref<1x2x128xf32, #tpu.memory_space<vmem>>, vector<1x2x128xf32>
    %4 = vector.shape_cast %3 : vector<1x2x128xf32> to vector<2x128xf32>
    %c0_3 = arith.constant 0 : index
    %c0_4 = arith.constant 0 : index
    %c0_5 = arith.constant 0 : index
    %5 = vector.load %arg3[%c0_3, %c0_4, %c0_5] : memref<1x2x128xf32, #tpu.memory_space<vmem>>, vector<1x2x128xf32>
    %6 = vector.shape_cast %5 : vector<1x2x128xf32> to vector<2x128xf32>
    %c0_6 = arith.constant 0 : index
    %c0_7 = arith.constant 0 : index
    %c0_8 = arith.constant 0 : index
    %7 = vector.load %arg4[%c0_6, %c0_7, %c0_8] : memref<1x2x128xf32, #tpu.memory_space<vmem>>, vector<1x2x128xf32>
    %8 = vector.shape_cast %7 : vector<1x2x128xf32> to vector<2x128xf32>
    %c0_9 = arith.constant 0 : index
    %c0_10 = arith.constant 0 : index
    %c0_11 = arith.constant 0 : index
    %9 = vector.load %arg5[%c0_9, %c0_10, %c0_11] : memref<1x1x128xi32, #tpu.memory_space<vmem>>, vector<1x1x128xi32>
    %10 = vector.shape_cast %9 : vector<1x1x128xi32> to vector<1x128xi32>
    %c0_12 = arith.constant 0 : index
    %c0_13 = arith.constant 0 : index
    %c0_14 = arith.constant 0 : index
    %11 = vector.load %arg6[%c0_12, %c0_13, %c0_14] : memref<1x1x256xf32, #tpu.memory_space<vmem>>, vector<1x1x256xf32>
    %12 = vector.shape_cast %11 : vector<1x1x256xf32> to vector<1x256xf32>
    %c0_15 = arith.constant 0 : index
    %c0_16 = arith.constant 0 : index
    %c0_17 = arith.constant 0 : index
    %13 = vector.load %arg7[%c0_15, %c0_16, %c0_17] : memref<1x1x128xf32, #tpu.memory_space<vmem>>, vector<1x1x128xf32>
    %14 = vector.shape_cast %13 : vector<1x1x128xf32> to vector<1x128xf32>
    %cst = arith.constant 1.000000e+01 : f32
    %15 = vector.broadcast %cst : f32 to vector<2x128xf32>
    %16 = arith.mulf %15, %6 : vector<2x128xf32>
    %17 = arith.addf %4, %16 : vector<2x128xf32>
    %cst_18 = arith.constant 0.000000e+00 : f32
    %cst_19 = arith.constant 1.500000e+01 : f32
    %18 = vector.broadcast %cst_18 : f32 to vector<2x128xf32>
    %19 = arith.maximumf %18, %17 : vector<2x128xf32>
    %20 = vector.broadcast %cst_19 : f32 to vector<2x128xf32>
    %21 = arith.minimumf %20, %19 : vector<2x128xf32>
    %22 = arith.fptosi %21 : vector<2x128xf32> to vector<2x128xi32>
    %23 = vector.extract_strided_slice %22 {offsets = [1, 0], sizes = [1, 128], strides = [1, 1]} : vector<2x128xi32> to vector<1x128xi32>
    %c16_i32 = arith.constant 16 : i32
    %24 = vector.broadcast %c16_i32 : i32 to vector<1x128xi32>
    %25 = arith.muli %23, %24 : vector<1x128xi32>
    %26 = vector.extract_strided_slice %22 {offsets = [0, 0], sizes = [1, 128], strides = [1, 1]} : vector<2x128xi32> to vector<1x128xi32>
    %27 = arith.addi %25, %26 : vector<1x128xi32>
    %28 = tpu.iota {dimensions = array<i32: 0>} : vector<256x128xi32>
    %29 = vector.broadcast %27 : vector<1x128xi32> to vector<256x128xi32>
    %30 = arith.cmpi eq, %29, %28 : vector<256x128xi32>
    %31 = arith.extui %30 : vector<256x128xi1> to vector<256x128xi32>
    %32 = arith.sitofp %31 : vector<256x128xi32> to vector<256x128xf32>
    %cst_20 = arith.constant dense<0.000000e+00> : vector<1x128xf32>
    %33 = tpu.matmul %12, %32, %cst_20 {dimension_numbers = #tpu.dot_dimension_numbers<[1], [0], [0], [1], [0, 0, 1, 1], [], []>} : vector<1x256xf32>, vector<256x128xf32>, vector<1x128xf32> -> vector<1x128xf32>
    %34 = arith.fptosi %33 : vector<1x128xf32> to vector<1x128xi32>
    %35 = arith.cmpi ne, %10, %34 : vector<1x128xi32>
    %36 = arith.extui %35 : vector<1x128xi1> to vector<1x128xi32>
    %37 = arith.sitofp %36 : vector<1x128xi32> to vector<1x128xf32>
    %38 = arith.mulf %37, %14 : vector<1x128xf32>
    %39 = arith.subf %6, %8 : vector<2x128xf32>
    %40 = math.absf %39 : vector<2x128xf32>
    %41 = vector.broadcast %38 : vector<1x128xf32> to vector<2x128xf32>
    %42 = arith.mulf %40, %41 : vector<2x128xf32>
    %cst_21 = arith.constant 1.000000e+00 : f32
    %43 = vector.broadcast %cst_21 : f32 to vector<2x128xf32>
    %44 = arith.cmpf olt, %42, %43 : vector<2x128xf32>
    %cst_22 = arith.constant 5.000000e-01 : f32
    %45 = vector.broadcast %cst_22 : f32 to vector<2x128xf32>
    %46 = arith.mulf %45, %42 : vector<2x128xf32>
    %47 = arith.mulf %46, %42 : vector<2x128xf32>
    %cst_23 = arith.constant 5.000000e-01 : f32
    %48 = vector.broadcast %cst_23 : f32 to vector<2x128xf32>
    %49 = arith.subf %42, %48 : vector<2x128xf32>
    %50 = arith.select %44, %47, %49 : vector<2x128xi1>, vector<2x128xf32>
    %c0_24 = arith.constant 0 : index
    %c0_25 = arith.constant 0 : index
    %51 = vector.load %arg10[%c0_24, %c0_25] : memref<1x1xf32, #tpu.memory_space<vmem>>, vector<1x1xf32>
    %52 = vector.shape_cast %50 : vector<2x128xf32> to vector<1x2x128xf32>
    %cst_26 = arith.constant dense<0.000000e+00> : vector<1xf32>
    %53 = vector.multi_reduction <add>, %52, %cst_26 [1, 2] : vector<1x2x128xf32> to vector<1xf32>
    %54 = vector.shape_cast %53 : vector<1xf32> to vector<1x1x1xf32>
    %55 = vector.extract %54[0, 0, 0] : f32 from vector<1x1x1xf32>
    %56 = vector.broadcast %55 : f32 to vector<1x1xf32>
    %57 = arith.addf %51, %56 : vector<1x1xf32>
    %c0_27 = arith.constant 0 : index
    %c0_28 = arith.constant 0 : index
    %58 = vector.load %arg10[%c0_27, %c0_28] : memref<1x1xf32, #tpu.memory_space<vmem>>, vector<1x1xf32>
    tpu.vector_store %arg10[%c0_27, %c0_28], %57 {strides = array<i32>} : memref<1x1xf32, #tpu.memory_space<vmem>>, vector<1x1xf32>,
    %c0_29 = arith.constant 0 : index
    %c0_30 = arith.constant 0 : index
    %59 = vector.load %arg11[%c0_29, %c0_30] : memref<1x1xf32, #tpu.memory_space<vmem>>, vector<1x1xf32>
    %60 = vector.shape_cast %38 : vector<1x128xf32> to vector<1x1x128xf32>
    %cst_31 = arith.constant dense<0.000000e+00> : vector<1xf32>
    %61 = vector.multi_reduction <add>, %60, %cst_31 [1, 2] : vector<1x1x128xf32> to vector<1xf32>
    %62 = vector.shape_cast %61 : vector<1xf32> to vector<1x1x1xf32>
    %63 = vector.extract %62[0, 0, 0] : f32 from vector<1x1x1xf32>
    %64 = vector.broadcast %63 : f32 to vector<1x1xf32>
    %65 = arith.addf %59, %64 : vector<1x1xf32>
    %c0_32 = arith.constant 0 : index
    %c0_33 = arith.constant 0 : index
    %66 = vector.load %arg11[%c0_32, %c0_33] : memref<1x1xf32, #tpu.memory_space<vmem>>, vector<1x1xf32>
    tpu.vector_store %arg11[%c0_32, %c0_33], %65 {strides = array<i32>} : memref<1x1xf32, #tpu.memory_space<vmem>>, vector<1x1xf32>,
    %c0_34 = arith.constant 0 : index
    %c0_35 = arith.constant 0 : index
    %67 = vector.load %arg12[%c0_34, %c0_35] : memref<1x1xf32, #tpu.memory_space<vmem>>, vector<1x1xf32>
    %68 = vector.shape_cast %14 : vector<1x128xf32> to vector<1x1x128xf32>
    %cst_36 = arith.constant dense<0.000000e+00> : vector<1xf32>
    %69 = vector.multi_reduction <add>, %68, %cst_36 [1, 2] : vector<1x1x128xf32> to vector<1xf32>
    %70 = vector.shape_cast %69 : vector<1xf32> to vector<1x1x1xf32>
    %71 = vector.extract %70[0, 0, 0] : f32 from vector<1x1x1xf32>
    %72 = vector.broadcast %71 : f32 to vector<1x1xf32>
    %73 = arith.addf %67, %72 : vector<1x1xf32>
    %c0_37 = arith.constant 0 : index
    %c0_38 = arith.constant 0 : index
    %74 = vector.load %arg12[%c0_37, %c0_38] : memref<1x1xf32, #tpu.memory_space<vmem>>, vector<1x1xf32>
    tpu.vector_store %arg12[%c0_37, %c0_38], %73 {strides = array<i32>} : memref<1x1xf32, #tpu.memory_space<vmem>>, vector<1x1xf32>,
    %c1_i32 = arith.constant 1 : i32
    %75 = arith.cmpi eq, %arg1, %c1_i32 : i32
    %76 = arith.extui %75 : i1 to i32
    %c0_i32_39 = arith.constant 0 : i32
    %77 = arith.cmpi ne, %76, %c0_i32_39 : i32
    scf.if %77 {
      %c0_40 = arith.constant 0 : index
      %c0_41 = arith.constant 0 : index
      %78 = vector.load %arg11[%c0_40, %c0_41] : memref<1x1xf32, #tpu.memory_space<vmem>>, vector<1x1xf32>
      %c0_42 = arith.constant 0 : index
      %c0_43 = arith.constant 0 : index
      %79 = vector.load %arg12[%c0_42, %c0_43] : memref<1x1xf32, #tpu.memory_space<vmem>>, vector<1x1xf32>
      %c0_44 = arith.constant 0 : index
      %c0_45 = arith.constant 0 : index
      %80 = vector.load %arg10[%c0_44, %c0_45] : memref<1x1xf32, #tpu.memory_space<vmem>>, vector<1x1xf32>
      %cst_46 = arith.constant 1.000000e+00 : f32
      %81 = vector.broadcast %cst_46 : f32 to vector<1x1xf32>
      %82 = arith.mulf %81, %80 : vector<1x1xf32>
      %cst_47 = arith.constant 9.99999997E-7 : f32
      %83 = vector.broadcast %cst_47 : f32 to vector<1x1xf32>
      %84 = arith.addf %78, %83 : vector<1x1xf32>
      %85 = arith.divf %82, %84 : vector<1x1xf32>
      %c0_48 = arith.constant 0 : index
      %c0_49 = arith.constant 0 : index
      %c0_50 = arith.constant 0 : index
      %86 = vector.load %arg8[%c0_48, %c0_49, %c0_50] : memref<1x1x1xf32, #tpu.memory_space<vmem>>, vector<1x1x1xf32>
      %87 = vector.shape_cast %86 : vector<1x1x1xf32> to vector<1x1xf32>
      %88 = vector.shape_cast %85 : vector<1x1xf32> to vector<1x1x1xf32>
      tpu.vector_store %arg8[%c0_48, %c0_49, %c0_50], %88 {strides = array<i32>} : memref<1x1x1xf32, #tpu.memory_space<vmem>>, vector<1x1x1xf32>,
      %89 = arith.subf %79, %78 : vector<1x1xf32>
      %cst_51 = arith.constant 9.99999997E-7 : f32
      %90 = vector.broadcast %cst_51 : f32 to vector<1x1xf32>
      %91 = arith.addf %79, %90 : vector<1x1xf32>
      %92 = arith.divf %89, %91 : vector<1x1xf32>
      %c0_52 = arith.constant 0 : index
      %c0_53 = arith.constant 0 : index
      %c0_54 = arith.constant 0 : index
      %93 = vector.load %arg9[%c0_52, %c0_53, %c0_54] : memref<1x1x1xf32, #tpu.memory_space<vmem>>, vector<1x1x1xf32>
      %94 = vector.shape_cast %93 : vector<1x1x1xf32> to vector<1x1xf32>
      %95 = vector.shape_cast %92 : vector<1x1xf32> to vector<1x1x1xf32>
      tpu.vector_store %arg9[%c0_52, %c0_53, %c0_54], %95 {strides = array<i32>} : memref<1x1x1xf32, #tpu.memory_space<vmem>>, vector<1x1x1xf32>,
    } else {
    }
    return
  }
  func.func @transform_0(%arg0: i32, %arg1: i32) -> (i32, i32, i32) {
    %c0_i32 = arith.constant 0 : i32
    %c0_i32_0 = arith.constant 0 : i32
    %c0_i32_1 = arith.constant 0 : i32
    return %c0_i32, %c0_i32_0, %arg1 : i32, i32, i32
  }
  func.func @transform_1(%arg0: i32, %arg1: i32) -> (i32, i32, i32) {
    %c0_i32 = arith.constant 0 : i32
    %c0_i32_0 = arith.constant 0 : i32
    return %arg0, %c0_i32, %arg1 : i32, i32, i32
  }
  func.func @transform_2(%arg0: i32, %arg1: i32) -> (i32, i32, i32) {
    %c0_i32 = arith.constant 0 : i32
    %c0_i32_0 = arith.constant 0 : i32
    return %arg0, %c0_i32, %arg1 : i32, i32, i32
  }
  func.func @transform_3(%arg0: i32, %arg1: i32) -> (i32, i32, i32) {
    %c0_i32 = arith.constant 0 : i32
    %c0_i32_0 = arith.constant 0 : i32
    return %arg0, %c0_i32, %arg1 : i32, i32, i32
  }
  func.func @transform_4(%arg0: i32, %arg1: i32) -> (i32, i32, i32) {
    %c0_i32 = arith.constant 0 : i32
    %c0_i32_0 = arith.constant 0 : i32
    %c0_i32_1 = arith.constant 0 : i32
    return %arg0, %c0_i32, %c0_i32_0 : i32, i32, i32
  }
  func.func @transform_5(%arg0: i32, %arg1: i32) -> (i32, i32, i32) {
    %c0_i32 = arith.constant 0 : i32
    %c0_i32_0 = arith.constant 0 : i32
    return %arg0, %c0_i32, %arg1 : i32, i32, i32
  }
  func.func @transform_6(%arg0: i32, %arg1: i32) -> (i32, i32, i32) {
    %c0_i32 = arith.constant 0 : i32
    %c0_i32_0 = arith.constant 0 : i32
    %c0_i32_1 = arith.constant 0 : i32
    return %arg0, %c0_i32, %c0_i32_0 : i32, i32, i32
  }
  func.func @transform_7(%arg0: i32, %arg1: i32) -> (i32, i32, i32) {
    %c0_i32 = arith.constant 0 : i32
    %c0_i32_0 = arith.constant 0 : i32
    %c0_i32_1 = arith.constant 0 : i32
    return %arg0, %c0_i32, %c0_i32_0 : i32, i32, i32
  }
}

</mosaic_0001>

<bundles_post_ra>
// kernel: tpu_custom_call.1
= control target key start
LH: loop header
LB: loop body
LE: loop exit
PB: predicated region body
PF: predicated region fallthrough
CT: control target
= control target key end

     0   :  { %s2030_s0 = inlined_call_operand.hbm [shape: f32[1,2,256], index: 0, kind: input, shape index: {}]   ;;  %s2031_s1 = inlined_call_operand.hbm [shape: f32[2,2,256], index: 1, kind: input, shape index: {}]   ;;  %s2032_s2 = inlined_call_operand.hbm [shape: f32[2,2,256], index: 2, kind: input, shape index: {}]   ;;  %s2033_s3 = inlined_call_operand.hbm [shape: s32[2,1,256], index: 3, kind: input, shape index: {}]   ;;  %s2034_s4 = inlined_call_operand.hbm [shape: f32[2,1,256], index: 4, kind: input, shape index: {}]   ;;  %s2035_s5 = inlined_call_operand.vmem [shape: f32[2,1,256], index: 5, kind: input, shape index: {}]   ;;  %s2036_s6 = inlined_call_operand.vmem [shape: f32[2,1,1], index: 6, kind: output, shape index: {0}]   ;;  %s2037_s7 = inlined_call_operand.vmem [shape: f32[2,1,1], index: 7, kind: output, shape index: {1}]  }
   0x1   :  { %2048 = sst [smem:[#allocation25_spill]] %s2030_s0 }
   0x2   :  { %2049 = sst [smem:[#allocation26_spill]] %s2031_s1 }
   0x3   :  { %2050 = sst [smem:[#allocation27_spill]] %s2032_s2 }
   0x4   :  { %2051 = sst [smem:[#allocation28_spill]] %s2034_s4 }
   0x5   :  { %2052 = sst [smem:[#allocation29_spill]] %s2035_s5 }
   0x6   :  { %2053 = sst [smem:[#allocation30_spill]] %s2036_s6 }
   0x7   :  { %2054 = sst [smem:[#allocation31_spill]] %s2037_s7 }
   0x8   :  { %13 = vsyncpa [#allocation6], 0 }
   0x9   :  { %15 = vsyncpa [#allocation6 + $0x1], 0 }
   0xa   :  { %16 = vsyncpa [#allocation8], 0 }
   0xb   :  { %18 = vsyncpa [#allocation8 + $0x1], 0 }
   0xc   :  { %19 = vsyncpa [#allocation11], 0 }
   0xd   :  { %21 = vsyncpa [#allocation11 + $0x1], 0  ;;  %s1573_s24 = smov 0   ;;  %s1575_s25 = smov 0  }
   0xe   :  { %s1577_s26 = smov 0   ;;  %s1579_s27 = smov 0  }
   0xf   :  { %s1581_s28 = smov 0   ;;  %s1583_s29 = smov 0  }
  0x10   :  { %s1585_s30 = smov 0   ;;  %s1587_s8 = smov 0  }
  0x11   :  { %s1589_s9 = smov 0   ;;  %s1591_s10 = smov 0  }
  0x12   :  { %s1593_s11 = smov 0   ;;  %s1595_s12 = smov 0  }
  0x13   :  { %s1597_s13 = smov 0   ;;  %s1599_s14 = smov 0  }
  0x14 LB: > { %2055 = sst [smem:[#allocation17_spill]] %s1492_s28  ;;  %s2038_s15 = sadd.s32 4294967295, %s1528_s14   ;;  %s1528_s14 = sphi %s1599_s14, %s27_s14   ;;  %s1524_s13 = sphi %s1597_s13, %s2106_s13   ;;  %s1520_s12 = sphi %s1595_s12, %s2105_s12   ;;  %s1516_s11 = sphi %s1593_s11, %s2104_s11   ;;  %s1512_s10 = sphi %s1591_s10, %s2103_s10   ;;  %s1508_s9 = sphi %s1589_s9, %s2102_s9   ;;  %s1504_s8 = sphi %s1587_s8, %s2101_s8   ;;  %s1500_s30 = sphi %s1585_s30, %s2100_s30   ;;  %s1496_s29 = sphi %s1583_s29, %s2094_s29   ;;  %s1492_s28 = sphi %s1581_s28, %s2093_s28   ;;  %s1488_s27 = sphi %s1579_s27, %s2092_s27   ;;  %s1484_s26 = sphi %s1577_s26, %s2099_s26   ;;  %s1480_s25 = sphi %s1575_s25, %s2098_s25   ;;  %s1476_s24 = sphi %s1573_s24, %s2097_s24  }
  0x15   : > { %2056 = sst [smem:[#allocation18_spill]] %s1496_s29  ;;  %s36_s16 = sadd.s32 1, %s1520_s12 }
  0x16   : > { %2057 = sst [smem:[#allocation19_spill]] %s1512_s10  ;;  %p37_p0 = scmp.ge.s32.totalorder %s36_s16, 2 }
  0x17   : > { %2058 = sst [smem:[#allocation20_spill]] %s1516_s11  ;;  %s39_s17 = sadd.s32 1, %s1524_s13 }
  0x18   : > { %p54_p1 = scmp.eq.s32.totalorder %s1528_s14, 0  ;;  %p1647_p2 = scmp.eq.s32.totalorder %s2038_s15, 0 }
  0x19   : > { %s2108_s16 = smov (%p37_p0, %s36_s16), 0  ;;  %s2110_s17 = smov (!%p37_p0, %s39_s17), %s1524_s13 }
  0x1a   : > { %2060 = sst [smem:[#allocation21_spill]] %s2108_s16  ;;  %s1656_s19 = ssub.s32 %s1520_s12, %s2108_s16 }
  0x1b   : > { %s74_s20 = sadd.s32 1, %s1496_s29  ;;  %p41_p3 = scmp.ge.s32.totalorder %s2110_s17, 2 }
  0x1c   : > { %p44_p4 = scmp.eq.s32.totalorder %s1656_s19, 0  ;;  %p81_p5 = scmp.ne.s32.totalorder %s1496_s29, %s1492_s28 }
  0x1d   : > { %p87_p6 = scmp.ne.s32.totalorder %s1492_s28, %s1488_s27  ;;  %s2112_s17 = smov (%p41_p3, %s2110_s17), 0 }
  0x1e   : > { %2061 = sst [smem:[#allocation22_spill]] %s2112_s17  ;;  %p1667_p7 = por %p81_p5, %p54_p1 }
  0x1f   : > { %p1673_p8 = por %p87_p6, %p1647_p2  ;;  %s1679_s23 = ssub.s32 %s1524_s13, %s2112_s17 }
  0x20   : > { %s71_s27 = sor.u32 %s1679_s23, %s1656_s19  ;;  %p154_p9 = scmp.eq.s32.totalorder %s1679_s23, 0 }
  0x21   : > { %s2063_s22 = scalar_select %p1673_p8, 1, 0 }
  0x22   : > { %p72_p10 = scmp.eq.s32.totalorder %s71_s27, 0  ;;  %p1132_p11 = scmp.lt.s32.totalorder %s1528_s14, 4 }
  0x23   : > { %2064 = sst [smem:[#allocation23_spill]] %s2063_s22  ;;  %s292_s15 = sand.u32 1, %s1528_s14  }
  0x24   : > { %s294_s16 = sand.u32 1, %s1496_s29   ;;  %s2046_s6 = sshll.u32 %s1524_s13, 1 }
  0x25   : > { %s1688_s5 = scalar_select %p72_p10, %s1496_s29, %s74_s20  }
  0x26   : > { %s1690_s7 = sshll.u32 %s294_s16, 1  ;;  %s300_s17 = sadd.s32 %s1520_s12, %s2046_s6 }
  0x27   : > { %2065 = sst [smem:[#allocation24_spill]] %s1688_s5  ;;  %s296_s10 = scalar_lea.vmem [#allocation7], %s1690_s7 }
  0x28   : > { %s306_s11 = sshll.u32 %s296_s10, 4  ;;  %s1007_s22 = sshll.u32 %s300_s17, 1  ;;  %s307_s11 = int_to_ptr.vmem [resolvable:$true] %s306_s11 }
  0x29   : > { %s2066_s1 = sld [smem:[#allocation26_spill]]  ;;  %p1704_p12 = pnand %p1132_p11, %p1667_p7 }
  0x2a   : > { %s1708_s10 = scalar_lea.sflag [#allocation8], %s292_s15  ;;  %s2068_s2 = sld [smem:[#allocation27_spill]] }
  0x2b   : > { %p1014_p13 = scmp.ge.s32.totalorder %s1528_s14, 1  ;;  %p380_p0 = scmp.lt.s32.totalorder %s1528_s14, 5 }
  0x2c   : > { %s46_s28 = sadd.s32 1, %s1508_s9  ;;  %p53_p5 = scmp.ne.s32.totalorder %s1508_s9, %s1504_s8 }
  0x2d   : > { %p1723_p3 = pnand %p1014_p13, %p380_p0  ;;  %p59_p6 = scmp.ne.s32.totalorder %s1504_s8, %s1500_s30 }
  0x2e   : > { %s1736_s6 = scalar_select %p44_p4, %s1508_s9, %s46_s28  }
  0x2f   : > { %s302_s27 = scalar_lea.hbm %s2066_s1, %s1007_s22  ;;  %s342_s1 = scalar_lea.hbm %s2033_s3, %s300_s17 }
  0x30   : > { %s304_s5 = sshll.u32 %s302_s27, 4  ;;  %s1716_s21 = scalar_lea.hbm %s2068_s2, %s1007_s22  ;;  %s305_s5 = int_to_ptr.hbm [resolvable:$true] %s304_s5 }
  0x31   : > { %1122 = dma.hbm_to_vmem [thread:$0]  (!%p1704_p12), %s305_s5, 32, %s307_s11, %s1708_s10  }
  0x32   : > { %s344_s5 = sshll.u32 %s342_s1, 4  ;;  %s337_s11 = scalar_lea.vmem [#allocation10], %s294_s16  ;;  %s345_s5 = int_to_ptr.hbm [resolvable:$true] %s344_s5 }
  0x33   : > { %s346_s4 = sshll.u32 %s337_s11, 4  ;;  %s1727_s22 = scalar_lea.sflag [#allocation11], %s292_s15  ;;  %s347_s4 = int_to_ptr.vmem [resolvable:$true] %s346_s4 }
  0x34   : > { %1128 = dma.hbm_to_vmem [thread:$0]  (!%p1704_p12), %s345_s5, 16, %s347_s4, %s1727_s22  }
  0x35   : > { %s273_s17 = sand.u32 1, %s1508_s9   ;;  %s1004_s1 = sshll.u32 %s1520_s12, 1 }
  0x36   : > { %p55_p7 = por %p54_p1, %p53_p5  ;;  %p1748_p10 = por %p1647_p2, %p59_p6 }
  0x37   : > { %s1003_s16 = sshll.u32 %s273_s17, 1  ;;  %s2071_s0 = sld [smem:[#allocation25_spill]] }
  0x38   : > { %s277_s11 = scalar_lea.vmem [#allocation5], %s1003_s16  ;;  %p1117_p4 = pnand %p1132_p11, %p55_p7 }
  0x39   : > { %s285_s4 = sshll.u32 %s277_s11, 4  ;;  %s325_s28 = sshll.u32 %s1716_s21, 4  ;;  %s286_s4 = int_to_ptr.vmem [resolvable:$true] %s285_s4  ;;  %s326_s28 = int_to_ptr.hbm [resolvable:$true] %s325_s28 }
  0x3a   : > { %s274_s19 = scalar_lea.sflag [#allocation6], %s273_s17  ;;  %s156_s16 = sadd.s32 1, %s1484_s26 }
  0x3b   : > { %p163_p13 = scmp.ne.s32.totalorder %s1484_s26, %s1480_s25  ;;  %p169_p5 = scmp.ne.s32.totalorder %s1480_s25, %s1476_s24 }
  0x3c   : > { %s355_s11 = sand.u32 1, %s1484_s26   ;;  %s2072_s21 = sshll.u32 %s1524_s13, 1 }
  0x3d   : > { %s281_s5 = scalar_lea.hbm %s2071_s0, %s1004_s1  ;;  %s317_s1 = scalar_lea.vmem [#allocation9], %s1690_s7 }
  0x3e   : > { %s283_s30 = sshll.u32 %s281_s5, 4  ;;  %s327_s27 = sshll.u32 %s317_s1, 4  ;;  %s284_s30 = int_to_ptr.hbm [resolvable:$true] %s283_s30  ;;  %s328_s27 = int_to_ptr.vmem [resolvable:$true] %s327_s27 }
  0x3f   : > { %1119 = dma.hbm_to_vmem [thread:$0]  (!%p1117_p4), %s284_s30, 32, %s286_s4, %s274_s19  }
  0x40   : > { %1125 = dma.hbm_to_vmem [thread:$0]  (!%p1704_p12), %s326_s28, 32, %s328_s27, %s1708_s10  }
  0x41   : > { %s1768_s5 = scalar_select %p154_p9, %s1484_s26, %s156_s16  }
  0x42   : > { %p165_p0 = por %p163_p13, %p54_p1  ;;  %s2073_s1 = sld [smem:[#allocation28_spill]] }
  0x43   : > { %p1782_p6 = por %p169_p5, %p1647_p2  ;;  %s1012_s10 = sshll.u32 %s355_s11, 1 }
  0x44   : > { %s357_s23 = scalar_lea.vmem [#allocation12], %s1012_s10  ;;  %p1129_p1 = pnand %p1132_p11, %p165_p0 }
  0x45   : > { %s365_s30 = sshll.u32 %s357_s23, 4  ;;  %s386_s0 = sand.u32 (!%p1723_p3), 1, %s1504_s8   ;;  %s366_s30 = int_to_ptr.vmem [resolvable:$true] %s365_s30 }
  0x46   : > { %384 = sbr.rel (%p1723_p3) target bundleno = 531 (0x213), region = 44  ;;  %s1792_s24 = sshll.u32 (!%p1723_p3), %s386_s0, 1 }
  0x47   : > { %s387_s18 = scalar_lea.sflag (!%p1723_p3), [#allocation6], %s386_s0 }
  0x48   : > { %s361_s2 = scalar_lea.hbm %s2073_s1, %s2072_s21 }
  0x49   : > { %s363_s17 = sshll.u32 %s361_s2, 4  ;;  %s364_s17 = int_to_ptr.hbm [resolvable:$true] %s363_s17 }
  0x4a   : > { %1131 = dma.hbm_to_vmem [thread:$0]  (!%p1129_p1), %s364_s17, 32, %s366_s30, %s1727_s22  }
  0x4b   : > { %1459 = dma.done.wait (%p1748_p10), %s387_s18, 32  }
  0x4c   : > { %1461 = vsyncadd (%p1748_p10), %s387_s18, 4294967264  ;;  %s2075_s2 = sadd.s32 4294967295, %s1528_s14   ;;  %s2076_s28 = sld [smem:[#allocation17_spill]] }
  0x4d   : > { %s396_s27 = sand.u32 1, %s2075_s2  }
  0x4e   : > { %s397_s16 = scalar_lea.sflag [#allocation8], %s396_s27 }
  0x52   : > { %s398_s29 = sand.u32 1, %s2076_s28  }
  0x53   : > { %s1802_s19 = sshll.u32 %s398_s29, 1 }
  0x54   : > { %1463 = dma.done.wait (%p1673_p8), %s397_s16, 64  }
  0x55   : > { %1465 = vsyncadd (%p1673_p8), %s397_s16, 4294967232  ;;  %s417_s21 = scalar_lea.sflag [#allocation11], %s396_s27  ;;  %s1810_s7 = scalar_lea.vmem [#allocation10], %s398_s29 }
  0x56   : > { %1467 = dma.done.wait (%p1673_p8), %s417_s21, 16  }
  0x57   : > { %1469 = vsyncadd (%p1673_p8), %s417_s21, 4294967280  ;;  %s427_s1 = sand.u32 1, %s1480_s25  }
  0x58   : > { %s1817_s10 = sshll.u32 %s427_s1, 1 }
  0x59   : > { %1471 = dma.done.wait (%p1782_p6), %s417_s21, 32  }
  0x5a   : > { %1473 = vsyncadd (%p1782_p6), %s417_s21, 4294967264  ;;  %s2078_s23 = sld [smem:[#allocation20_spill]] }
  0x5b   : > { %s2079_s30 = sld [smem:[#allocation19_spill]] }
  0x5c   : > { %s2080_s22 = sld [smem:[#allocation30_spill]] }
  0x5d   : > { %s2081_s21 = sld [smem:[#allocation31_spill]] }
  0x5e   : > { %s2082_s11 = sld [smem:[#allocation29_spill]] }
  0x60   : > { %p488_p2 = scmp.lt.s32.totalorder %s2078_s23, 1 }
  0x61   : > { %p490_p9 = scmp.lt.s32.totalorder %s2079_s30, 1  ;;  %p1020_p8 = scmp.ne.s32.totalorder %s2079_s30, 0 }
  0x62   : > { %s2114_s23 = smov (!%p488_p2, %s2078_s23), 1 }
  0x63   : > { %s491_s0 = scalar_select %p490_p9, %s2079_s30, 1 }
  0x64   : > { %s1019_s18 = sshll.u32 %s2114_s23, 1  ;;  %s497_s27 = scalar_lea.vmem %s2080_s22, %s2114_s23 }
  0x65   : > { %s1835_s29 = sadd.s32 %s1019_s18, %s491_s0  ;;  %s500_s1 = scalar_lea.vmem %s2081_s21, %s2114_s23 }
  0x66   : > { %s494_s4 = scalar_lea.vmem %s2082_s11, %s1835_s29  ;;  %504 = sbr.rel (%p1020_p8) target bundleno = 111 (0x6f), region = 68 }
  0x6b   : > { %vm505_vm0 = vcmask 0   ;;  %v1530_v0 = vmov 0.0  }
  0x6c   : > { %506 = vst.msk [vmem:[#allocation2] sm:$0x1] %vm505_vm0, %v1530_v0 }
  0x6d   : > { %507 = vst.msk [vmem:[#allocation3] sm:$0x1] %vm505_vm0, %v1530_v0 }
  0x6e   : > { %508 = vst.msk [vmem:[#allocation4] sm:$0x1] %vm505_vm0, %v1530_v0 }
  0x6f PF: > { %s2083_s0 = scalar_lea.vmem [#allocation5], %s1792_s24  ;;  %s2084_s18 = scalar_lea.vmem [#allocation7], %s1802_s19  ;;  %v523_v7 = vlaneseq  ;;  %v1531_v25 = vmov 1.0   ;;  %v514_v52 = vld [vmem:[%s494_s4] sm:$0x1]  ;;  %v1532_v0 = vmov 0.0  }
  0x70   : > { %v509_v1 = vld [vmem:[%s2083_s0] sm:$0x3]  ;;  %v1850_v2 = vld [vmem:[%s2084_s18] sm:$0x3]  ;;  %s2085_s24 = scalar_lea.vmem [#allocation12], %s1817_s10  ;;  %s2087_s17 = scalar_lea.vmem [#allocation9], %s1802_s19 }
  0x71   : > { %v515_v3 = vmul.f32 10.0, %v1850_v2  ;;  %v1853_v11 = vshrl.u32 %v523_v7, 7  ;;  %v513_v49 = vld [vmem:[%s2085_s24] sm:$0x3]  ;;  %v511_v59 = vld [vmem:[%s2087_s17] sm:$0x3] }
  0x72   : > { %v654_v50 = vperm.slane %v513_v49, 0  ;;  %v655_v51 = vperm.slane %v513_v49, 1  ;;  %v512_v60 = vld [vmem:[%s1810_s7] sm:$0x1]  ;;  %v703_v63 = vsub.f32 %v1850_v2, %v511_v59  ;;  %s2088_s30 = sld [smem:[#allocation19_spill]] }
  0x73   : > { %v516_v4 = vadd.f32 %v515_v3, %v509_v1  ;;  %v539_v15 = vadd.s32 120, %v1853_v11  ;;  %v555_v17 = vadd.s32 248, %v1853_v11  ;;  %v538_v18 = vadd.s32 112, %v1853_v11 }
  0x74   : > { %v554_v19 = vadd.s32 240, %v1853_v11  ;;  %v537_v21 = vadd.s32 104, %v1853_v11  ;;  %v553_v22 = vadd.s32 232, %v1853_v11  ;;  %v536_v23 = vadd.s32 96, %v1853_v11 }
  0x75   : > { %v517_v5 = vmax.f32 %v516_v4, 0.0  ;;  %v552_v24 = vadd.s32 224, %v1853_v11  ;;  %v535_v26 = vadd.s32 88, %v1853_v11  ;;  %v551_v27 = vadd.s32 216, %v1853_v11 }
  0x76   : > { %v534_v28 = vadd.s32 80, %v1853_v11  ;;  %v550_v29 = vadd.s32 208, %v1853_v11  ;;  %v533_v30 = vadd.s32 72, %v1853_v11  ;;  %v549_v31 = vadd.s32 200, %v1853_v11 }
  0x77   : > { %v518_v6 = vmin.f32 %v517_v5, 15.0  ;;  %v532_v32 = vadd.s32 64, %v1853_v11  ;;  %v548_v33 = vadd.s32 192, %v1853_v11  ;;  %v531_v34 = vadd.s32 56, %v1853_v11 }
  0x78   : > { %v547_v35 = vadd.s32 184, %v1853_v11  ;;  %v530_v36 = vadd.s32 48, %v1853_v11  ;;  %v546_v37 = vadd.s32 176, %v1853_v11  ;;  %v529_v38 = vadd.s32 40, %v1853_v11  ;;  %p1087_p11 = scmp.ne.s32.totalorder %s2088_s30, 1 }
  0x79   : > { %vm1090_vm1 = vcmp.lt.s32.totalorder %v518_v6, 0  ;;  %v1091_v8 = vceil.f32 %v518_v6  ;;  %v1092_v9 = vfloor.f32 %v518_v6  ;;  %v545_v39 = vadd.s32 168, %v1853_v11 }
  0x7a   : > { %v528_v40 = vadd.s32 32, %v1853_v11  ;;  %v544_v41 = vadd.s32 160, %v1853_v11  ;;  %v527_v42 = vadd.s32 24, %v1853_v11  ;;  %v543_v43 = vadd.s32 152, %v1853_v11 }
  0x7b   : > { %v1093_v10 = vsel %vm1090_vm1, %v1091_v8, %v1092_v9  ;;  %v526_v44 = vadd.s32 16, %v1853_v11  ;;  %v542_v45 = vadd.s32 144, %v1853_v11  ;;  %v525_v46 = vadd.s32 8, %v1853_v11 }
  0x7c   : > { %v1094_v12 = vcvt.f32.s32 %v1093_v10  ;;  %v541_v47 = vadd.s32 136, %v1853_v11  ;;  %v540_v48 = vadd.s32 128, %v1853_v11  ;;  %v704_v4 = vand.u32 2147483647, %v703_v63 }
  0x7e   : > { %v520_v13 = vmul.u32 16, %v1094_v12  ;;  %v521_v14 = vrot.slane %v1094_v12, 7 }
  0x80   : > { %v522_v16 = vadd.s32 %v521_v14, %v520_v13 }
  0x82   : > { %v1859_v20 = vperm.slane %v522_v16, 1 }
  0x84   : > { %vm572_vm2 = vcmp.eq.s32.totalorder %v1859_v20, %v539_v15  ;;  %vm588_vm3 = vcmp.eq.s32.totalorder %v1859_v20, %v555_v17  ;;  %vm571_vm4 = vcmp.eq.s32.totalorder %v1859_v20, %v538_v18  ;;  %vm587_vm5 = vcmp.eq.s32.totalorder %v1859_v20, %v554_v19 }
  0x85   : > { %1053 = vmatpush.msk.msra.mxu0 %vm572_vm2, %v1531_v25  ;;  %1069 = vmatpush.msk.msra.mxu1 %vm588_vm3, %v1531_v25  ;;  %vm570_vm6 = vcmp.eq.s32.totalorder %v1859_v20, %v537_v21  ;;  %vm586_vm7 = vcmp.eq.s32.totalorder %v1859_v20, %v553_v22  ;;  %vm569_vm8 = vcmp.eq.s32.totalorder %v1859_v20, %v536_v23 }
  0x86   : > { %vm585_vm9 = vcmp.eq.s32.totalorder %v1859_v20, %v552_v24  ;;  %vm568_vm10 = vcmp.eq.s32.totalorder %v1859_v20, %v535_v26  ;;  %vm584_vm11 = vcmp.eq.s32.totalorder %v1859_v20, %v551_v27  ;;  %vm567_vm12 = vcmp.eq.s32.totalorder %v1859_v20, %v534_v28 }
  0x87   : > { %1054 = vmatpush.msk.msra.mxu0 %vm571_vm4, %v1531_v25  ;;  %1070 = vmatpush.msk.msra.mxu1 %vm587_vm5, %v1531_v25  ;;  %vm583_vm13 = vcmp.eq.s32.totalorder %v1859_v20, %v550_v29  ;;  %vm566_vm14 = vcmp.eq.s32.totalorder %v1859_v20, %v533_v30  ;;  %vm582_vm15 = vcmp.eq.s32.totalorder %v1859_v20, %v549_v31 }
  0x88   : > { %vm565_vm0 = vcmp.eq.s32.totalorder %v1859_v20, %v532_v32  ;;  %vm581_vm1 = vcmp.eq.s32.totalorder %v1859_v20, %v548_v33  ;;  %vm564_vm2 = vcmp.eq.s32.totalorder %v1859_v20, %v531_v34  ;;  %vm580_vm3 = vcmp.eq.s32.totalorder %v1859_v20, %v547_v35  ;;  %v714_v33 = vld [vmem:[#allocation2] sm:$0x1] }
  0x89   : > { %1055 = vmatpush.msk.msra.mxu0 %vm570_vm6, %v1531_v25  ;;  %1071 = vmatpush.msk.msra.mxu1 %vm586_vm7, %v1531_v25  ;;  %vm563_vm4 = vcmp.eq.s32.totalorder %v1859_v20, %v530_v36  ;;  %vm579_vm5 = vcmp.eq.s32.totalorder %v1859_v20, %v546_v37  ;;  %vm562_vm6 = vcmp.eq.s32.totalorder %v1859_v20, %v529_v38  ;;  %v730_v36 = vld [vmem:[#allocation3] sm:$0x1]  ;;  %v745_v37 = vld [vmem:[#allocation4] sm:$0x1] }
  0x8a   : > { %vm578_vm7 = vcmp.eq.s32.totalorder %v1859_v20, %v545_v39 }
  0x8b   : > { %1056 = vmatpush.msk.msra.mxu0 %vm569_vm8, %v1531_v25  ;;  %1072 = vmatpush.msk.msra.mxu1 %vm585_vm9, %v1531_v25  ;;  %vm561_vm8 = vcmp.eq.s32.totalorder %v1859_v20, %v528_v40  ;;  %vm577_vm9 = vcmp.eq.s32.totalorder %v1859_v20, %v544_v41 }
  0x8d   : > { %1057 = vmatpush.msk.msra.mxu0 %vm568_vm10, %v1531_v25  ;;  %1073 = vmatpush.msk.msra.mxu1 %vm584_vm11, %v1531_v25  ;;  %vm560_vm10 = vcmp.eq.s32.totalorder %v1859_v20, %v527_v42  ;;  %vm576_vm11 = vcmp.eq.s32.totalorder %v1859_v20, %v543_v43 }
  0x8f   : > { %1058 = vmatpush.msk.msra.mxu0 %vm567_vm12, %v1531_v25  ;;  %1074 = vmatpush.msk.msra.mxu1 %vm583_vm13, %v1531_v25  ;;  %vm559_vm12 = vcmp.eq.s32.totalorder %v1859_v20, %v526_v44  ;;  %vm575_vm13 = vcmp.eq.s32.totalorder %v1859_v20, %v542_v45 }
  0x91   : > { %1059 = vmatpush.msk.msra.mxu0 %vm566_vm14, %v1531_v25  ;;  %1075 = vmatpush.msk.msra.mxu1 %vm582_vm15, %v1531_v25  ;;  %vm558_vm14 = vcmp.eq.s32.totalorder %v1859_v20, %v525_v46  ;;  %vm574_vm15 = vcmp.eq.s32.totalorder %v1859_v20, %v541_v47 }
  0x93   : > { %1060 = vmatpush.msk.msra.mxu0 %vm565_vm0, %v1531_v25  ;;  %1076 = vmatpush.msk.msra.mxu1 %vm581_vm1, %v1531_v25  ;;  %vm557_vm0 = vcmp.eq.s32.totalorder %v1859_v20, %v1853_v11  ;;  %vm573_vm1 = vcmp.eq.s32.totalorder %v1859_v20, %v540_v48 }
  0x95   : > { %1061 = vmatpush.msk.msra.mxu0 %vm564_vm2, %v1531_v25  ;;  %1077 = vmatpush.msk.msra.mxu1 %vm580_vm3, %v1531_v25  ;;  %vm731_vm2 = vcmask 1040384  }
  0x96   : > { %v746_v53 = vsel %vm731_vm2, %v514_v52, 0.0 }
  0x97   : > { %1062 = vmatpush.msk.msra.mxu0 %vm563_vm4, %v1531_v25  ;;  %1078 = vmatpush.msk.msra.mxu1 %vm579_vm5, %v1531_v25  ;;  %vm715_vm5 = vcmask 1041408  }
  0x98   : > { %747 = vadd.xlane.f32.xlu1 %v746_v53 }
  0x99   : > { %1063 = vmatpush.msk.msra.mxu0 %vm562_vm6, %v1531_v25  ;;  %1079 = vmatpush.msk.msra.mxu1 %vm578_vm7, %v1531_v25  ;;  %vm728_vm7 = vcmask 0  }
  0x9b   : > { %1064 = vmatpush.msk.msra.mxu0 %vm561_vm8, %v1531_v25  ;;  %1080 = vmatpush.msk.msra.mxu1 %vm577_vm9, %v1531_v25 }
  0x9d   : > { %1065 = vmatpush.msk.msra.mxu0 %vm560_vm10, %v1531_v25  ;;  %1081 = vmatpush.msk.msra.mxu1 %vm576_vm11, %v1531_v25 }
  0x9f   : > { %1066 = vmatpush.msk.msra.mxu0 %vm559_vm12, %v1531_v25  ;;  %1082 = vmatpush.msk.msra.mxu1 %vm575_vm13, %v1531_v25 }
  0xa1   : > { %1067 = vmatpush.msk.msra.mxu0 %vm558_vm14, %v1531_v25  ;;  %1083 = vmatpush.msk.msra.mxu1 %vm574_vm15, %v1531_v25 }
  0xa3   : > { %1068 = vmatpush.msk.msra.mxu0 %vm557_vm0, %v1531_v25  ;;  %1084 = vmatpush.msk.msra.mxu1 %vm573_vm1, %v1531_v25 }
  0xa4   : > { %674 = vmatmul.f32.vlgmr.msra.gmra.mxu0 %v654_v50  ;;  %694 = vmatmul.f32.vlgmr.msra.gmra.mxu1 %v655_v51 }
 0x10b   : > { %v748_v13 = vpop.xlane.xlu1 %747 }
 0x10c   : > { %v749_v14 = vrot.slane %v748_v13, 4 }
 0x10e   : > { %v750_v17 = vadd.f32 %v749_v14, %v748_v13 }
 0x110   : > { %v751_v20 = vrot.slane %v750_v17, 2 }
 0x112   : > { %v752_v26 = vadd.f32 %v751_v20, %v750_v17 }
 0x114   : > { %v753_v29 = vrot.slane %v752_v26, 1 }
 0x116   : > { %v754_v32 = vadd.f32 %v753_v29, %v752_v26 }
 0x121   : > { %v675_v54 = vpop.f32.mrf.mxu0  ;;  %v695_v55 = vpop.f32.mrf.mxu1 }
 0x122   : > { %v696_v56 = vadd.f32 %v695_v55, %v675_v54 }
 0x124   : > { %vm1095_vm3 = vcmp.lt.s32.totalorder %v696_v56, 0  ;;  %v1096_v57 = vceil.f32 %v696_v56  ;;  %v1097_v58 = vfloor.f32 %v696_v56 }
 0x126   : > { %v1098_v61 = vsel %vm1095_vm3, %v1096_v57, %v1097_v58 }
 0x127   : > { %v1099_v62 = vcvt.f32.s32 %v1098_v61 }
 0x129   : > { %vm699_vm4 = vcmp.ne.s32.totalorder %v512_v60, %v1099_v62 }
 0x12a   : > { %v1085_v1 = vsel %vm699_vm4, 1.0, %v1532_v0 }
 0x12b   : > { %v702_v3 = vmul.f32 %v1085_v1, %v514_v52 }
 0x12d   : > { %v706_v5 = vperm.slane %v702_v3, 0  ;;  %v732_v12 = vsel %vm731_vm2, %v702_v3, 0.0 }
 0x12f   : > { %v708_v6 = vmul.f32 %v706_v5, %v704_v4 }
 0x131   : > { %v710_v7 = vmul.f32 0.5, %v708_v6  ;;  %v1086_v9 = vadd.f32 -0.5, %v708_v6  ;;  %vm709_vm6 = vcmp.lt.f32.partialorder %v708_v6, 1.0 }
 0x133   : > { %v711_v8 = vmul.f32 %v710_v7, %v708_v6 }
 0x135   : > { %v713_v10 = vsel %vm709_vm6, %v711_v8, %v1086_v9 }
 0x136   : > { %v716_v11 = vsel %vm715_vm5, %v713_v10, 0.0 }
 0x137   : > { %717 = vadd.xlane.f32.xlu0 %v716_v11 }
 0x13f   : > { %733 = vadd.xlane.f32.xlu0 %v732_v12 }
 0x1aa   : > { %v718_v2 = vpop.xlane.xlu0 %717 }
 0x1ab   : > { %v719_v15 = vrot.slane %v718_v2, 4 }
 0x1ad   : > { %v720_v16 = vadd.f32 %v719_v15, %v718_v2 }
 0x1af   : > { %v721_v18 = vrot.slane %v720_v16, 2 }
 0x1b1   : > { %v722_v19 = vadd.f32 %v721_v18, %v720_v16 }
 0x1b2   : > { %v734_v21 = vpop.xlane.xlu0 %733 }
 0x1b3   : > { %v735_v22 = vrot.slane %v734_v21, 4  ;;  %v723_v23 = vrot.slane %v722_v19, 1 }
 0x1b5   : > { %v736_v24 = vadd.f32 %v735_v22, %v734_v21  ;;  %v724_v25 = vadd.f32 %v723_v23, %v722_v19 }
 0x1b7   : > { %v737_v27 = vrot.slane %v736_v24, 2  ;;  %1100 = vpush %v724_v25 }
 0x1b9   : > { %v738_v28 = vadd.f32 %v737_v27, %v736_v24 }
 0x1bb   : > { %v739_v30 = vrot.slane %v738_v28, 1 }
 0x1bd   : > { %v740_v31 = vadd.f32 %v739_v30, %v738_v28 }
 0x1bf   : > { %1102 = vpush %v740_v31 }
 0x1c0   : > { %1104 = vpush %v754_v32 }
 0x1e8   : > { %s1101_s4 = spop %1100 }
 0x1e9   : > { %v726_v34 = vstv %s1101_s4 }
 0x1ea   : > { %v727_v35 = vadd.f32 %v726_v34, %v714_v33 }
 0x1ec   : > { %729 = vst.msk [vmem:[#allocation2] sm:$0x1] %vm728_vm7, %v727_v35 }
 0x1f0   : > { %s1103_s19 = spop %1102 }
 0x1f1   : > { %v742_v38 = vstv %s1103_s19  ;;  %s1105_s7 = spop %1104  ;;  %762 = sbr.rel (%p1087_p11) target bundleno = 531 (0x213), region = 72 }
 0x1f2   : > { %v743_v39 = vadd.f32 %v742_v38, %v730_v36  ;;  %v756_v40 = vstv %s1105_s7 }
 0x1f3   : > { %v757_v41 = vadd.f32 %v756_v40, %v745_v37 }
 0x1f4   : > { %744 = vst.msk [vmem:[#allocation3] sm:$0x1] %vm728_vm7, %v743_v39 }
 0x1f5   : > { %758 = vst.msk [vmem:[#allocation4] sm:$0x1] %vm728_vm7, %v757_v41 }
 0x1f6   : > { %v765_v61 = vld [vmem:[#allocation2] sm:$0x1] }
 0x1fb   : > { %v763_v42 = vld [vmem:[#allocation3] sm:$0x1] }
 0x1fc   : > { %v764_v43 = vld [vmem:[#allocation4] sm:$0x1]  ;;  %v766_v44 = vadd.f32 1e-06, %v763_v42 }
 0x1fd   : > { %v784_v45 = vadd.f32 1e-06, %v764_v43  ;;  %v783_v62 = vsub.f32 %v764_v43, %v763_v42 }
 0x1fe   : > { %1248 = vrcp.f32 %v766_v44  ;;  %vm772_vm8 = vweird.f32 %v766_v44  ;;  %v778_v49 = vand.u32 2147483648, %v766_v44  ;;  %v776_v52 = vand.u32 2147483647, %v766_v44 }
 0x1ff   : > { %1250 = vrcp.f32 %v784_v45  ;;  %v796_v53 = vand.u32 2147483648, %v784_v45  ;;  %vm790_vm10 = vweird.f32 %v784_v45  ;;  %v794_v55 = vand.u32 2147483647, %v784_v45 }
 0x200   : > { %v779_v57 = vor.u32 1.1754944e-38, %v778_v49  ;;  %vm777_vm13 = vcmp.eq.f32.partialorder %v776_v52, 8.507059e+37 }
 0x201   : > { %v797_v60 = vor.u32 1.1754944e-38, %v796_v53  ;;  %vm795_vm15 = vcmp.eq.f32.partialorder %v794_v55, 8.507059e+37 }
 0x204   : > { %v1249_v46 = vpop.eup %1248 }
 0x205   : > { %v1251_v47 = vpop.eup %1250  ;;  %v768_v48 = vmul.f32 %v1249_v46, %v766_v44  ;;  %vm773_vm9 = vweird.f32 %v1249_v46 }
 0x206   : > { %v786_v50 = vmul.f32 %v1251_v47, %v784_v45  ;;  %vm791_vm11 = vweird.f32 %v1251_v47  ;;  %vm774_vm12 = vmor %vm772_vm8, %vm773_vm9 }
 0x207   : > { %v769_v51 = vsub.f32 1.0, %v768_v48  ;;  %vm792_vm14 = vmor %vm790_vm10, %vm791_vm11 }
 0x208   : > { %v787_v54 = vsub.f32 1.0, %v786_v50 }
 0x209   : > { %v770_v56 = vmul.f32 %v1249_v46, %v769_v51 }
 0x20a   : > { %v788_v58 = vmul.f32 %v1251_v47, %v787_v54 }
 0x20b   : > { %v771_v59 = vadd.f32 %v1249_v46, %v770_v56 }
 0x20c   : > { %v789_v63 = vadd.f32 %v1251_v47, %v788_v58 }
 0x20d   : > { %v775_v0 = vsel %vm774_vm12, %v1249_v46, %v771_v59 }
 0x20e   : > { %v780_v1 = vsel %vm777_vm13, %v779_v57, %v775_v0  ;;  %v793_v3 = vsel %vm792_vm14, %v1251_v47, %v789_v63 }
 0x20f   : > { %v781_v4 = vmul.f32 %v780_v1, %v765_v61  ;;  %v798_v5 = vsel %vm795_vm15, %v797_v60, %v793_v3 }
 0x210   : > { %v799_v6 = vmul.f32 %v798_v5, %v783_v62 }
 0x211   : > { %782 = vst.msk [vmem:[%s497_s27] sm:$0x1] %vm728_vm7, %v781_v4 }
 0x212   : > { %800 = vst.msk [vmem:[%s500_s1] sm:$0x1] %vm728_vm7, %v799_v6 }
 0x213 PF: > { %s27_s14 = sadd.s32 1, %s1528_s14   ;;  %s2092_s27 = sld [smem:[#allocation17_spill]] }
 0x214   : > { %p1983_p12 = scmp.ge.s32.totalorder %s27_s14, 6   ;;  %s2093_s28 = sld [smem:[#allocation18_spill]] }
 0x215   : > { %s2094_s29 = sld [smem:[#allocation24_spill]]  ;;  %s2097_s24 = smov %s1480_s25 }
 0x216   : > { %s2095_s23 = sld [smem:[#allocation21_spill]]  ;;  %s2098_s25 = smov %s1484_s26 }
 0x217   : > { %s2096_s1 = sld [smem:[#allocation22_spill]]  ;;  %s2099_s26 = smov %s1768_s5 }
 0x218   : > { %s2100_s30 = smov %s1504_s8  ;;  %s2101_s8 = smov %s1508_s9 }
 0x219   : > { %s2102_s9 = smov %s1736_s6  ;;  %s2103_s10 = smov %s1520_s12 }
 0x21a   : > { %s2104_s11 = smov %s1524_s13  ;;  %26 = sbr.rel (!%p1983_p12) target bundleno = 20 (0x14), region = 155 }
 0x21c   : > { %s2105_s12 = smov %s2095_s23 }
 0x21d   : > { %s2106_s13 = smov %s2096_s1 }
 0x21f   :  { %830 = vsyncpa [#allocation6], 1 }
 0x220   :  { %832 = vsyncpa [#allocation6 + $0x1], 1 }
 0x221   :  { %833 = vsyncpa [#allocation8], 1 }
 0x222   :  { %835 = vsyncpa [#allocation8 + $0x1], 1 }
 0x223   :  { %836 = vsyncpa [#allocation11], 1 }
 0x224   :  { %838 = vsyncpa [#allocation11 + $0x1], 1 }

</bundles_post_ra>
